<compile_context>
chip_gen: v5e
topology: v5e:2x2
jax: 0.10.0
libtpu: 0.0.40
codegen_flags: <defaults>
</compile_context>

<pallas_src>
import math

import jax
import jax.numpy as jnp
from jax.experimental import pallas as pl
from jax.experimental.pallas import tpu as pltpu


def _attention_kernel(x_ref, w_ref, mask_ref, out_ref, a_ref):
    x = x_ref[...]          # (TB, S, D) f32
    w = w_ref[...]          # (1, D)     f32  (broadcasts over TB, S)
    mask = mask_ref[...]    # (TB, S)    f32

    # VPU multiply + lane reduce over D -> (TB, S). Avoids the N=1 MXU matvec
    # and the non-view (B*S, D) reshape of the previous version.
    eij = jnp.tanh(jnp.sum(x * w, axis=-1))

    a = jnp.exp(eij) * mask
    # Keep exact division (not approx reciprocal) to preserve the tight match
    # with the torch reference; +1e-10 applied after the divide, as in torch.
    a = a / jnp.sum(a, axis=1, keepdims=True) + 1e-10

    # VPU multiply + sublane reduce over S -> (TB, D); x is reused from the
    # same VMEM tile, so it is read from HBM exactly once per tile.
    out_ref[...] = jnp.sum(x * a[:, :, None], axis=1)

    # Lane-dense (TB, S) writeback; the [..., None] happens in the wrapper.
    a_ref[...] = a


def _choose_tile_b(B, S, D, budget_bytes=4 << 20):
    """Pick a batch tile: whole batch if it fits a few MiB, else a multiple of 8
    so the (TB, S)/(TB, D) blocks keep clean (8,128) sublane tiling."""
    row_bytes = (S * D + 2 * S + D) * 4  # x row + mask + a + out per batch row, f32
    tb = max(1, budget_bytes // max(row_bytes, 1))
    if tb >= B:
        return B
    tb = max(8, (tb // 8) * 8)
    return tb if tb <= B else B


def attention_forward(x, weight, mask=None, tile_b=None):
    """x: (B, S, D) f32; weight: (D, 1) f32; mask: optional (B, S) f32.
    Returns (out: (B, D), a: (B, S, 1)) matching the torch module."""
    B, S, D = x.shape
    if mask is None:
        mask = jnp.ones((B, S), dtype=jnp.float32)

    w_row = weight.reshape(1, D).astype(jnp.float32)  # lane-dense weight

    tb = tile_b if tile_b is not None else _choose_tile_b(B, S, D)
    grid = (pl.cdiv(B, tb),)

    out, a2d = pl.pallas_call(
        _attention_kernel,
        out_shape=(
            jax.ShapeDtypeStruct((B, D), jnp.float32),
            jax.ShapeDtypeStruct((B, S), jnp.float32),
        ),
        grid=grid,
        in_specs=[
            pl.BlockSpec((tb, S, D), lambda i: (i, 0, 0)),   # x tile
            pl.BlockSpec((1, D), lambda i: (0, 0)),          # weight, resident
            pl.BlockSpec((tb, S), lambda i: (i, 0)),         # mask tile
        ],
        out_specs=(
            pl.BlockSpec((tb, D), lambda i: (i, 0)),         # out tile
            pl.BlockSpec((tb, S), lambda i: (i, 0)),         # a tile (lane-dense)
        ),
        compiler_params=pltpu.CompilerParams(
            dimension_semantics=("parallel",),               # independent batch tiles
        ),
    )(x, w_row, mask)

    return out, a2d[..., None]


def _reference(x, weight, mask=None):
    B, S, D = x.shape
    eij = jnp.tanh((x.reshape(-1, D) @ weight).reshape(B, S))
    a = jnp.exp(eij)
    if mask is not None:
        a = a * mask
    a = a / jnp.sum(a, axis=1, keepdims=True) + 1e-10
    weighted = x * a[..., None]
    return jnp.sum(weighted, axis=1), a[..., None]


def xavier_uniform(key, shape):
    fan_in, fan_out = shape[0], shape[1]
    bound = math.sqrt(6.0 / (fan_in + fan_out))
    return jax.random.uniform(key, shape, dtype=jnp.float32,
                              minval=-bound, maxval=bound)


if __name__ == "__main__":
    key = jax.random.PRNGKey(0)

    # --- small shape consistent with the module: batch=2, step_dim=8, feature_dim=32 ---
    B, S, D = 2, 8, 32
    kx, kw, km, kx2 = jax.random.split(key, 4)
    x = jax.random.normal(kx, (B, S, D), dtype=jnp.float32)
    weight = xavier_uniform(kw, (D, 1))
    mask = (jax.random.uniform(km, (B, S)) > 0.2).astype(jnp.float32)

    out, a = attention_forward(x, weight, mask)
    jax.block_until_ready(out)
    jax.block_until_ready(a)

    out_ref, a_ref = _reference(x, weight, mask)
    assert out.shape == (B, D) and a.shape == (B, S, 1)
    assert jnp.allclose(out, out_ref, atol=1e-5, rtol=1e-5)
    assert jnp.allclose(a, a_ref, atol=1e-6, rtol=1e-5)

    # --- larger shape exercising the batch-tiled grid (grid > 1) ---
    B2, S2, D2 = 32, 16, 128
    x2 = jax.random.normal(kx2, (B2, S2, D2), dtype=jnp.float32)
    w2 = xavier_uniform(kw, (D2, 1))
    out2, a2 = attention_forward(x2, w2, None, tile_b=8)   # force 4 grid steps
    jax.block_until_ready(out2)
    out2_ref, a2_ref = _reference(x2, w2, None)
    assert jnp.allclose(out2, out2_ref, atol=1e-5, rtol=1e-5)
    assert jnp.allclose(a2, a2_ref, atol=1e-6, rtol=1e-5)

    print("KERNEL_OK")
</pallas_src>

<mosaic_0001>
module attributes {stable_mosaic.version = 11 : i64} {
  func.func @_attention_kernel(%arg0: i32, %arg1: memref<2x8x32xf32, #tpu.memory_space<vmem>>, %arg2: memref<1x32xf32, #tpu.memory_space<vmem>>, %arg3: memref<2x8xf32, #tpu.memory_space<vmem>>, %arg4: memref<2x32xf32, #tpu.memory_space<vmem>>, %arg5: memref<2x8xf32, #tpu.memory_space<vmem>>) attributes {dimension_semantics = [#tpu.dimension_semantics<parallel>], iteration_bounds = array<i64: 1>, scalar_prefetch = 0 : i64, scratch_operands = 0 : i64, tpu.core_type = #tpu.core_type<tc>, window_params = [{transform_indices = @transform_0, window_bounds = array<i64: 2, 8, 32>}, {pipeline_mode = #tpu.pipeline_mode<synchronous>, transform_indices = @transform_1, window_bounds = array<i64: 1, 32>}, {transform_indices = @transform_2, window_bounds = array<i64: 2, 8>}, {transform_indices = @transform_3, window_bounds = array<i64: 2, 32>}, {transform_indices = @transform_4, window_bounds = array<i64: 2, 8>}]} {
    %c0 = arith.constant 0 : index
    %c0_0 = arith.constant 0 : index
    %c0_1 = arith.constant 0 : index
    %0 = vector.load %arg1[%c0, %c0_0, %c0_1] : memref<2x8x32xf32, #tpu.memory_space<vmem>>, vector<2x8x32xf32>
    %c0_2 = arith.constant 0 : index
    %c0_3 = arith.constant 0 : index
    %1 = vector.load %arg2[%c0_2, %c0_3] : memref<1x32xf32, #tpu.memory_space<vmem>>, vector<1x32xf32>
    %c0_4 = arith.constant 0 : index
    %c0_5 = arith.constant 0 : index
    %2 = vector.load %arg3[%c0_4, %c0_5] : memref<2x8xf32, #tpu.memory_space<vmem>>, vector<2x8xf32>
    %3 = vector.shape_cast %1 : vector<1x32xf32> to vector<1x1x32xf32>
    %4 = vector.broadcast %3 : vector<1x1x32xf32> to vector<2x8x32xf32>
    %5 = arith.mulf %0, %4 : vector<2x8x32xf32>
    %cst = arith.constant dense<0.000000e+00> : vector<2x8xf32>
    %6 = vector.multi_reduction <add>, %5, %cst [2] : vector<2x8x32xf32> to vector<2x8xf32>
    %7 = math.tanh %6 : vector<2x8xf32>
    %8 = math.exp %7 : vector<2x8xf32>
    %9 = arith.mulf %8, %2 : vector<2x8xf32>
    %cst_6 = arith.constant dense<0.000000e+00> : vector<2xf32>
    %10 = vector.multi_reduction <add>, %9, %cst_6 [1] : vector<2x8xf32> to vector<2xf32>
    %11 = vector.shape_cast %10 : vector<2xf32> to vector<2x1xf32>
    %12 = vector.broadcast %11 : vector<2x1xf32> to vector<2x8xf32>
    %13 = arith.divf %9, %12 : vector<2x8xf32>
    %cst_7 = arith.constant 1.000000e-10 : f32
    %14 = vector.broadcast %cst_7 : f32 to vector<2x8xf32>
    %15 = arith.addf %13, %14 : vector<2x8xf32>
    %16 = vector.shape_cast %15 : vector<2x8xf32> to vector<2x8x1xf32>
    %17 = vector.broadcast %16 : vector<2x8x1xf32> to vector<2x8x32xf32>
    %18 = arith.mulf %0, %17 : vector<2x8x32xf32>
    %cst_8 = arith.constant dense<0.000000e+00> : vector<2x32xf32>
    %19 = vector.multi_reduction <add>, %18, %cst_8 [1] : vector<2x8x32xf32> to vector<2x32xf32>
    %c0_9 = arith.constant 0 : index
    %c0_10 = arith.constant 0 : index
    %20 = vector.load %arg4[%c0_9, %c0_10] : memref<2x32xf32, #tpu.memory_space<vmem>>, vector<2x32xf32>
    tpu.vector_store %arg4[%c0_9, %c0_10], %19 {strides = array<i32>} : memref<2x32xf32, #tpu.memory_space<vmem>>, vector<2x32xf32>,
    %c0_11 = arith.constant 0 : index
    %c0_12 = arith.constant 0 : index
    %21 = vector.load %arg5[%c0_11, %c0_12] : memref<2x8xf32, #tpu.memory_space<vmem>>, vector<2x8xf32>
    tpu.vector_store %arg5[%c0_11, %c0_12], %15 {strides = array<i32>} : memref<2x8xf32, #tpu.memory_space<vmem>>, vector<2x8xf32>,
    return
  }
  func.func @transform_0(%arg0: i32) -> (i32, i32, i32) {
    %c0_i32 = arith.constant 0 : i32
    %c0_i32_0 = arith.constant 0 : i32
    %c0_i32_1 = arith.constant 0 : i32
    return %arg0, %c0_i32, %c0_i32_0 : i32, i32, i32
  }
  func.func @transform_1(%arg0: i32) -> (i32, i32) {
    %c0_i32 = arith.constant 0 : i32
    %c0_i32_0 = arith.constant 0 : i32
    %c0_i32_1 = arith.constant 0 : i32
    return %c0_i32, %c0_i32_0 : i32, i32
  }
  func.func @transform_2(%arg0: i32) -> (i32, i32) {
    %c0_i32 = arith.constant 0 : i32
    %c0_i32_0 = arith.constant 0 : i32
    return %arg0, %c0_i32 : i32, i32
  }
  func.func @transform_3(%arg0: i32) -> (i32, i32) {
    %c0_i32 = arith.constant 0 : i32
    %c0_i32_0 = arith.constant 0 : i32
    return %arg0, %c0_i32 : i32, i32
  }
  func.func @transform_4(%arg0: i32) -> (i32, i32) {
    %c0_i32 = arith.constant 0 : i32
    %c0_i32_0 = arith.constant 0 : i32
    return %arg0, %c0_i32 : i32, i32
  }
}

</mosaic_0001>

<bundles_post_ra>
// kernel: tpu_custom_call.1
= control target key start
LH: loop header
LB: loop body
LE: loop exit
PB: predicated region body
PF: predicated region fallthrough
CT: control target
= control target key end

     0   :  { %10 = vsyncpa [#allocation3], 0  ;;  %s453_s0 = inlined_call_operand.hbm [shape: f32[2,8,32], index: 0, kind: input, shape index: {}]   ;;  %s454_s1 = inlined_call_operand.hbm [shape: f32[1,32], index: 1, kind: input, shape index: {}]   ;;  %s455_s2 = inlined_call_operand.hbm [shape: f32[2,8], index: 2, kind: input, shape index: {}]   ;;  %s456_s3 = inlined_call_operand.hbm [shape: f32[2,32], index: 3, kind: output, shape index: {0}]   ;;  %s457_s4 = inlined_call_operand.hbm [shape: f32[2,8], index: 4, kind: output, shape index: {1}]  }
   0x1   :  { %11 = vsyncpa [#allocation6], 0 }
   0x2   :  { %12 = vsyncpa [#allocation4], 0  ;;  %s32_s17 = sshll.u32 %s454_s1, 4  ;;  %s33_s17 = int_to_ptr.hbm [resolvable:$true] %s32_s17 }
   0x3   :  { %13 = vsyncpa [#allocation10], 0  ;;  %s382_s18 = smov [#allocation5]   ;;  %s18_s22 = sshll.u32 %s453_s0, 4  ;;  %s19_s22 = int_to_ptr.hbm [resolvable:$true] %s18_s22 }
   0x4   :  { %s34_s19 = sshll.u32 %s382_s18, 4  ;;  %s383_s23 = smov [#allocation2]   ;;  %s35_s19 = int_to_ptr.vmem [resolvable:$true] %s34_s19 }
   0x5   :  { %37 = dma.hbm_to_vmem [thread:$0]  %s33_s17, 16, %s35_s19, [#allocation6]  }
   0x6   :  { %s20_s24 = sshll.u32 %s383_s23, 4  ;;  %s384_s25 = smov 128   ;;  %s21_s24 = int_to_ptr.vmem [resolvable:$true] %s20_s24 }
   0x7   :  { %s385_s26 = smov 8   ;;  %s43_s1 = sshll.u32 %s455_s2, 4  ;;  %s44_s1 = int_to_ptr.hbm [resolvable:$true] %s43_s1 }
   0x8   :  { %26 = dma.hbm_to_vmem [thread:$0]  %s19_s22, 256, %s21_s24, [#allocation3], %s384_s25, %s384_s25, %s385_s26  }
   0x9   :  { %s386_s29 = smov [#allocation7]  }
   0xa   :  { %s45_s30 = sshll.u32 %s386_s29, 4  ;;  %s46_s30 = int_to_ptr.vmem [resolvable:$true] %s45_s30 }
   0xb   :  { %48 = dma.hbm_to_vmem [thread:$0]  %s44_s1, 32, %s46_s30, [#allocation6]  }
   0xc   :  { %374 = dma.done.wait [#allocation3], 256  }
   0xd   :  { %375 = vsyncadd [#allocation3], 4294967040 }
   0xe   :  { %376 = dma.done.wait [#allocation6], 48  }
   0xf   :  { %377 = vsyncadd [#allocation6], 4294967248  ;;  %v85_v0 = vlaneseq  ;;  %v424_v2 = vld [vmem:[#allocation2] sm:$0xff]  ;;  %v241_v3 = vld [vmem:[#allocation5] ss:$0 sm:$0xff]  ;;  %vm70_vm0 = vcmask 261120  }
  0x10   :  { %v64_v4 = vld [vmem:[#allocation7] sm:$0x3]  ;;  %v68_v5 = vmul.f32 %v241_v3, %v424_v2  ;;  %v427_v7 = vld [vmem:[#allocation2 + $0x8] sm:$0xff]  ;;  %v387_v12 = vmov 0   ;;  %vm114_vm1 = vcmask 1041409   ;;  %vm117_vm2 = vcmask 58368  }
  0x11   :  { %v86_v1 = vshrl.u32 %v85_v0, 7  ;;  %v84_v6 = vperm.slane %v64_v4, 0  ;;  %v69_v9 = vmul.f32 %v241_v3, %v427_v7  ;;  %v91_v10 = vperm.slane %v64_v4, 1  ;;  %238 = vset.pattern.permute.xlu2 %v387_v12  ;;  %240 = vset.pattern.permute.xlu0 %v387_v12  ;;  %s388_s0 = smov [#allocation9]   ;;  %s213_s7 = sshll.u32 %s457_s4, 4  ;;  %s214_s7 = int_to_ptr.hbm [resolvable:$true] %s213_s7 }
  0x12   :  { %v71_v8 = vsel %vm70_vm0, %v68_v5, 0.0  ;;  %v432_v26 = vand.u32 127, %v85_v0  ;;  %s211_s2 = sshll.u32 %s388_s0, 4  ;;  %s389_s4 = smov [#allocation8]   ;;  %vm188_vm11 = vcmask 254976   ;;  %s212_s2 = int_to_ptr.vmem [resolvable:$true] %s211_s2 }
  0x13   :  { %237 = vset.pattern.permute.xlu1 %v86_v1  ;;  %72 = vadd.xlane.f32.xlu0 %v71_v8  ;;  %v74_v11 = vsel %vm70_vm0, %v69_v9, 0.0  ;;  %s200_s8 = sshll.u32 %s389_s4, 4  ;;  %s202_s11 = sshll.u32 %s456_s3, 4  ;;  %s201_s8 = int_to_ptr.vmem [resolvable:$true] %s200_s8  ;;  %s203_s11 = int_to_ptr.hbm [resolvable:$true] %s202_s11 }
  0x1b   :  { %89 = vperm.xlu1 %237, %v84_v6   ;;  %75 = vadd.xlane.f32.xlu0 %v74_v11 }
  0x23   :  { %96 = vperm.xlu1 %237, %v91_v10  }
  0x2b   :  { %239 = vset.pattern.permute.xlu1 %v387_v12 }
  0x86   :  { %v73_v13 = vpop.xlane.xlu0 %72 }
  0x87   :  { %242 = vtanh.f32 %v73_v13 }
  0x8d   :  { %v243_v14 = vpop.eup %242  ;;  %v90_v17 = vpop.permute.xlu1 %89 }
  0x8e   :  { %v79_v15 = vmul.f32 1.442695, %v243_v14  ;;  %v76_v16 = vpop.xlane.xlu0 %75 }
  0x8f   :  { %244 = vtanh.f32 %v76_v16 }
  0x90   :  { %246 = vpow2.f32 %v79_v15 }
  0x95   :  { %v245_v18 = vpop.eup %244  ;;  %v97_v23 = vpop.permute.xlu1 %96 }
  0x96   :  { %v247_v19 = vpop.eup %246  ;;  %v81_v20 = vmul.f32 1.442695, %v245_v18 }
  0x97   :  { %v100_v21 = vmul.f32 %v247_v19, %v90_v17 }
  0x98   :  { %248 = vpow2.f32 %v81_v20 }
  0x99   :  { %105 = vperm.xlu2 %238, %v100_v21  }
  0x9e   :  { %v249_v22 = vpop.eup %248 }
  0x9f   :  { %v101_v24 = vmul.f32 %v249_v22, %v97_v23 }
  0xa1   :  { %108 = vperm.xlu2 %238, %v101_v24  }
  0xf3   :  { %v106_v25 = vpop.permute.xlu2 %105 }
  0xf4   :  { %v112_v28 = vperm.slane %v106_v25, %v432_v26 }
  0xfb   :  { %v109_v27 = vpop.permute.xlu2 %108 }
  0xfc   :  { %v113_v29 = vperm.slane %v109_v27, %v432_v26 }
  0xfe   :  { %v115_v30 = vsel %vm114_vm1, %v113_v29, %v112_v28 }
  0xff   :  { %v118_v31 = vsel %vm117_vm2, %v115_v30, 0.0 }
 0x100   :  { %119 = vadd.xlane.f32.xlu0 %v118_v31 }
 0x173   :  { %v120_v32 = vpop.xlane.xlu0 %119 }
 0x174   :  { %v122_v33 = vperm.slane %v120_v32, 0  ;;  %v123_v34 = vperm.slane %v120_v32, 1 }
 0x176   :  { %250 = vrcp.f32 %v122_v33  ;;  %v137_v41 = vand.u32 2147483648, %v122_v33  ;;  %v152_v42 = vand.u32 2147483648, %v123_v34  ;;  %v135_v44 = vand.u32 2147483647, %v122_v33 }
 0x177   :  { %252 = vrcp.f32 %v123_v34  ;;  %v150_v46 = vand.u32 2147483647, %v123_v34  ;;  %vm131_vm5 = vweird.f32 %v122_v33  ;;  %vm146_vm6 = vweird.f32 %v123_v34 }
 0x178   :  { %v138_v49 = vor.u32 1.1754944e-38, %v137_v41  ;;  %v153_v50 = vor.u32 1.1754944e-38, %v152_v42  ;;  %vm136_vm9 = vcmp.eq.f32.partialorder %v135_v44, 8.507059e+37 }
 0x179   :  { %vm151_vm10 = vcmp.eq.f32.partialorder %v150_v46, 8.507059e+37 }
 0x17c   :  { %v251_v35 = vpop.eup %250 }
 0x17d   :  { %v253_v36 = vpop.eup %252  ;;  %v127_v37 = vmul.f32 %v251_v35, %v122_v33  ;;  %vm132_vm3 = vweird.f32 %v251_v35 }
 0x17e   :  { %v142_v38 = vmul.f32 %v253_v36, %v123_v34  ;;  %vm147_vm4 = vweird.f32 %v253_v36  ;;  %vm133_vm7 = vmor %vm131_vm5, %vm132_vm3 }
 0x17f   :  { %v128_v39 = vsub.f32 1.0, %v127_v37  ;;  %vm148_vm8 = vmor %vm146_vm6, %vm147_vm4 }
 0x180   :  { %v143_v40 = vsub.f32 1.0, %v142_v38 }
 0x181   :  { %v129_v43 = vmul.f32 %v251_v35, %v128_v39 }
 0x182   :  { %v144_v45 = vmul.f32 %v253_v36, %v143_v40 }
 0x183   :  { %v130_v47 = vadd.f32 %v251_v35, %v129_v43 }
 0x184   :  { %v145_v48 = vadd.f32 %v253_v36, %v144_v45 }
 0x185   :  { %v134_v51 = vsel %vm133_vm7, %v251_v35, %v130_v47 }
 0x186   :  { %v149_v52 = vsel %vm148_vm8, %v253_v36, %v145_v48  ;;  %v139_v53 = vsel %vm136_vm9, %v138_v49, %v134_v51 }
 0x187   :  { %v154_v54 = vsel %vm151_vm10, %v153_v50, %v149_v52  ;;  %v140_v55 = vmul.f32 %v139_v53, %v100_v21 }
 0x188   :  { %v155_v56 = vmul.f32 %v154_v54, %v101_v24 }
 0x189   :  { %v156_v57 = vadd.f32 1e-10, %v140_v55 }
 0x18a   :  { %v157_v58 = vadd.f32 1e-10, %v155_v56 }
 0x18b   :  { %160 = vperm.xlu1 %239, %v156_v57  }
 0x18c   :  { %165 = vperm.xlu2 %238, %v157_v58  }
 0x1e6   :  { %v166_v59 = vpop.permute.xlu2 %165 }
 0x1e7   :  { %v169_v60 = vmul.f32 %v166_v59, %v427_v7  ;;  %v191_v1 = vperm.slane %v166_v59, %v432_v26 }
 0x1e9   :  { %v177_v61 = vsel %vm70_vm0, %v169_v60, 0.0 }
 0x1ea   :  { %v178_v62 = vrot.slane %v177_v61, 4 }
 0x1ec   :  { %v179_v63 = vadd.f32 %v178_v62, %v177_v61 }
 0x1ee   :  { %v180_v5 = vrot.slane %v179_v63, 2 }
 0x1f0   :  { %v181_v9 = vadd.f32 %v180_v5, %v179_v63 }
 0x1f2   :  { %v182_v12 = vrot.slane %v181_v9, 1 }
 0x1fd   :  { %v161_v0 = vpop.permute.xlu1 %160 }
 0x1fe   :  { %v168_v3 = vmul.f32 %v161_v0, %v424_v2  ;;  %v190_v4 = vperm.slane %v161_v0, %v432_v26  ;;  %v183_v2 = vadd.f32 %v182_v12, %v181_v9 }
 0x200   :  { %v170_v6 = vsel %vm70_vm0, %v168_v3, 0.0  ;;  %v192_v7 = vsel %vm114_vm1, %v191_v1, %v190_v4 }
 0x201   :  { %v171_v8 = vrot.slane %v170_v6, 4  ;;  %194 = vst.msk [vmem:[#allocation9] sm:$0x3] %vm117_vm2, %v192_v7 }
 0x202   :  { %216 = dma.vmem_to_hbm [thread:$0]  %s212_s2, 32, %s214_s7, [#allocation10]  }
 0x203   :  { %v172_v10 = vadd.f32 %v171_v8, %v170_v6 }
 0x205   :  { %v173_v11 = vrot.slane %v172_v10, 2 }
 0x207   :  { %v174_v13 = vadd.f32 %v173_v11, %v172_v10 }
 0x209   :  { %v175_v14 = vrot.slane %v174_v13, 1 }
 0x20b   :  { %v176_v15 = vadd.f32 %v175_v14, %v174_v13 }
 0x20d   :  { %v186_v16 = vsel %vm114_vm1, %v183_v2, %v176_v15 }
 0x20e   :  { %189 = vst.msk [vmem:[#allocation8] sm:$0x3] %vm188_vm11, %v186_v16 }
 0x20f   :  { %205 = dma.vmem_to_hbm [thread:$0]  %s201_s8, 32, %s203_s11, [#allocation4]  }
 0x210   :  { %378 = dma.done.wait [#allocation4], 32  }
 0x211   :  { %379 = vsyncadd [#allocation4], 4294967264 }
 0x212   :  { %380 = dma.done.wait [#allocation10], 32  }
 0x213   :  { %381 = vsyncadd [#allocation10], 4294967264 }
 0x214   :  { %225 = vsyncpa [#allocation3], 1 }
 0x215   :  { %226 = vsyncpa [#allocation6], 1 }
 0x216   :  { %227 = vsyncpa [#allocation4], 1 }
 0x217   :  { %228 = vsyncpa [#allocation10], 1 }

</bundles_post_ra>
